<compile_context>
chip_gen: v7x
topology: tpu7x:2x2x1
jax: 0.10.0
libtpu: 0.0.40
codegen_flags: <defaults>
</compile_context>

<pallas_src>
import functools

import jax
import jax.numpy as jnp
from jax.experimental import pallas as pl
from jax.experimental.pallas import tpu as pltpu


# ---------------------------------------------------------------------------
# Kernels
# ---------------------------------------------------------------------------

def _gaussian_sample_kernel(x_ref, wm_ref, bm_ref, wl_ref, bl_ref,
                            mask_ref, eps_ref,
                            mean_ref, logvar_ref, z_ref):
    x = x_ref[...]
    mean = jnp.dot(x, wm_ref[...], preferred_element_type=jnp.float32) + bm_ref[...]
    logvar = jnp.dot(x, wl_ref[...], preferred_element_type=jnp.float32) + bl_ref[...]
    mean_ref[...] = mean
    logvar_ref[...] = logvar
    # Reparameterized sample + masking (exp goes to the EUP, the rest to the VPU).
    z_ref[...] = (mean + jnp.exp(0.5 * logvar) * eps_ref[...]) * mask_ref[...]


def _gaussian_nosample_kernel(x_ref, wm_ref, bm_ref, wl_ref, bl_ref,
                              mask_ref,
                              mean_ref, logvar_ref, z_ref):
    x = x_ref[...]
    mean = jnp.dot(x, wm_ref[...], preferred_element_type=jnp.float32) + bm_ref[...]
    logvar = jnp.dot(x, wl_ref[...], preferred_element_type=jnp.float32) + bl_ref[...]
    mean_ref[...] = mean
    logvar_ref[...] = logvar
    # No eps, no exp: z = mean * mask (avoids inf*0 -> NaN if logvar blows up).
    z_ref[...] = mean * mask_ref[...]


# ---------------------------------------------------------------------------
# Tile policy
# ---------------------------------------------------------------------------

_TM_MAX = 1024                        # rows; 512-1024 already saturates HBM BW
_TILE_VMEM_BUDGET = 32 * 1024 * 1024  # bytes of VMEM for tiles (portable budget)
_VMEM_LIMIT_BYTES = 48 * 1024 * 1024  # explicit scoped-VMEM limit for Mosaic


def _round_up(x, m):
    return (x + m - 1) // m * m


def _choose_tm(M, D_in, Z, sample):
    """Row-tile size: as large as the VMEM budget allows, multiple of 8,
    never larger than the array, and >=2 grid steps when M >= 16 (v7x cores)."""
    if M <= 8:
        return M  # single block equal to the full row extent
    # f32 bytes per tile row, double-buffered by the pipeline:
    #   x (D_in) + mask (1) + [eps (Z)] + mean/logvar/z outputs (3Z)
    per_row = 2 * 4 * (D_in + 1 + 3 * Z + (Z if sample else 0))
    # Resident weight/bias blocks (constant index_map), counted x2 conservatively.
    resident = 2 * 4 * (2 * D_in * Z + 2 * Z)
    tm = max(8, (_TILE_VMEM_BUDGET - resident) // per_row)
    tm = min(tm, _TM_MAX)
    if M >= 16:
        tm = min(tm, _round_up(pl.cdiv(M, 2), 8))  # keep >= 2 grid steps
    tm = min(tm, (M // 8) * 8)                      # block never exceeds the array
    return max(8, (tm // 8) * 8)


# ---------------------------------------------------------------------------
# Forward
# ---------------------------------------------------------------------------

@functools.partial(jax.jit, static_argnames=("sample",))
def gaussian_layer_forward(inputs, mask, packed_params, eps=None, *, sample):
    """inputs: (B, T, D_in) f32, mask: (B, T) f32, eps: (B, T, Z) f32 or None.
    packed_params: output of pack_params() (weights already in (D_in, Z))."""
    B, T, D_in = inputs.shape
    wm, bm, wl, bl = packed_params
    Z = wm.shape[1]
    M = B * T

    if sample and eps is None:
        raise ValueError("sample=True requires eps of shape (B, T, Z)")

    # Free, contiguous reshapes (no HBM pass).
    x2 = inputs.reshape(M, D_in)
    mask2 = mask.reshape(M, 1)

    tm = _choose_tm(M, D_in, Z, sample)
    grid = (pl.cdiv(M, tm),)

    row = lambda c: pl.BlockSpec((tm, c), lambda i: (i, 0))
    const = lambda r, c: pl.BlockSpec((r, c), lambda i: (0, 0))

    in_specs = [row(D_in), const(D_in, Z), const(1, Z),
                const(D_in, Z), const(1, Z), row(1)]
    args = [x2, wm, bm, wl, bl, mask2]

    flops = 2 * 2 * M * D_in * Z
    bytes_accessed = 4 * (M * (D_in + 1 + 3 * Z) + 2 * (D_in * Z + Z))

    if sample:
        in_specs.append(row(Z))
        args.append(eps.reshape(M, Z))
        kernel = _gaussian_sample_kernel
        cost = pl.CostEstimate(flops=flops, transcendentals=M * Z,
                               bytes_accessed=bytes_accessed + 4 * M * Z)
    else:
        kernel = _gaussian_nosample_kernel
        cost = pl.CostEstimate(flops=flops, transcendentals=0,
                               bytes_accessed=bytes_accessed)

    out_shapes = (jax.ShapeDtypeStruct((M, Z), jnp.float32),
                  jax.ShapeDtypeStruct((M, Z), jnp.float32),
                  jax.ShapeDtypeStruct((M, Z), jnp.float32))

    mean2, logvar2, z2 = pl.pallas_call(
        kernel,
        out_shape=out_shapes,
        grid_spec=pltpu.PrefetchScalarGridSpec(
            num_scalar_prefetch=0,
            grid=grid,
            in_specs=in_specs,
            out_specs=(row(Z), row(Z), row(Z)),
        ),
        compiler_params=pltpu.CompilerParams(
            dimension_semantics=("parallel",),
            vmem_limit_bytes=_VMEM_LIMIT_BYTES),
        cost_estimate=cost,
    )(*args)

    # Contiguous (M, Z) -> (B, T, Z) reshapes are free.
    return (z2.reshape(B, T, Z),
            mean2.reshape(B, T, Z),
            logvar2.reshape(B, T, Z))


# ---------------------------------------------------------------------------
# Parameter helpers / reference
# ---------------------------------------------------------------------------

def init_params(key, input_size, latent_z_size):
    """Deterministic synthetic init (nn.Linear-like uniform bounds), PyTorch layout."""
    k1, k2, k3, k4 = jax.random.split(key, 4)
    bound = 1.0 / jnp.sqrt(input_size)
    w_mean = jax.random.uniform(k1, (latent_z_size, input_size),
                                minval=-bound, maxval=bound, dtype=jnp.float32)
    b_mean = jax.random.uniform(k2, (latent_z_size,),
                                minval=-bound, maxval=bound, dtype=jnp.float32)
    w_logvar = jax.random.uniform(k3, (latent_z_size, input_size),
                                  minval=-bound, maxval=bound, dtype=jnp.float32)
    b_logvar = jax.random.uniform(k4, (latent_z_size,),
                                  minval=-bound, maxval=bound, dtype=jnp.float32)
    return (w_mean, b_mean, w_logvar, b_logvar)


def pack_params(params):
    """One-time packing (outside the per-call path): weights -> (D_in, Z),
    biases -> (1, Z)."""
    w_mean, b_mean, w_logvar, b_logvar = params
    Z = w_mean.shape[0]
    return (jnp.asarray(w_mean.T, jnp.float32),
            jnp.asarray(b_mean, jnp.float32).reshape(1, Z),
            jnp.asarray(w_logvar.T, jnp.float32),
            jnp.asarray(b_logvar, jnp.float32).reshape(1, Z))


def reference_forward(inputs, mask, params, eps, sample):
    """Pure-JAX reference matching the PyTorch module."""
    w_mean, b_mean, w_logvar, b_logvar = params
    mean_qs = inputs @ w_mean.T + b_mean
    logvar_qs = inputs @ w_logvar.T + b_logvar
    if sample:
        z = (mean_qs + jnp.exp(0.5 * logvar_qs) * eps) * mask[..., None]
    else:
        z = mean_qs * mask[..., None]
    return z, mean_qs, logvar_qs


# ---------------------------------------------------------------------------
# Demo / correctness check
# ---------------------------------------------------------------------------

if __name__ == "__main__":
    key = jax.random.PRNGKey(0)
    k_param, k_x, k_mask, k_eps = jax.random.split(key, 4)

    B, T, D_in, Z = 2, 8, 32, 16   # batch, batch_len, input_size, latent_z_size

    params = init_params(k_param, D_in, Z)
    packed = pack_params(params)   # one-time weight packing (not per-forward)
    inputs = jax.random.normal(k_x, (B, T, D_in), dtype=jnp.float32)
    mask = (jax.random.uniform(k_mask, (B, T)) > 0.3).astype(jnp.float32)
    eps = jax.random.normal(k_eps, (B, T, Z), dtype=jnp.float32)

    # sample=True path (reparameterized draw with host-provided eps).
    z, mean_qs, logvar_qs = gaussian_layer_forward(
        inputs, mask, packed, eps, sample=True)
    jax.block_until_ready((z, mean_qs, logvar_qs))
    z_ref, mean_ref, logvar_ref = reference_forward(inputs, mask, params, eps, True)
    assert jnp.allclose(z, z_ref, atol=1e-5, rtol=1e-5)
    assert jnp.allclose(mean_qs, mean_ref, atol=1e-5, rtol=1e-5)
    assert jnp.allclose(logvar_qs, logvar_ref, atol=1e-5, rtol=1e-5)

    # sample=False path (specialized kernel: no eps streamed, no exp).
    z, mean_qs, logvar_qs = gaussian_layer_forward(
        inputs, mask, packed, None, sample=False)
    jax.block_until_ready((z, mean_qs, logvar_qs))
    z_ref, mean_ref, logvar_ref = reference_forward(inputs, mask, params, eps, False)
    assert jnp.allclose(z, z_ref, atol=1e-5, rtol=1e-5)
    assert jnp.allclose(mean_qs, mean_ref, atol=1e-5, rtol=1e-5)
    assert jnp.allclose(logvar_qs, logvar_ref, atol=1e-5, rtol=1e-5)

    print("KERNEL_OK")
</pallas_src>

<mosaic_0001>
module attributes {stable_mosaic.version = 11 : i64} {
  func.func @_gaussian_sample_kernel(%arg0: i32, %arg1: memref<8x32xf32, #tpu.memory_space<vmem>>, %arg2: memref<32x16xf32, #tpu.memory_space<vmem>>, %arg3: memref<1x16xf32, #tpu.memory_space<vmem>>, %arg4: memref<32x16xf32, #tpu.memory_space<vmem>>, %arg5: memref<1x16xf32, #tpu.memory_space<vmem>>, %arg6: memref<8x1xf32, #tpu.memory_space<vmem>>, %arg7: memref<8x16xf32, #tpu.memory_space<vmem>>, %arg8: memref<8x16xf32, #tpu.memory_space<vmem>>, %arg9: memref<8x16xf32, #tpu.memory_space<vmem>>, %arg10: memref<8x16xf32, #tpu.memory_space<vmem>>) attributes {dimension_semantics = [#tpu.dimension_semantics<parallel>], iteration_bounds = array<i64: 2>, scalar_prefetch = 0 : i64, scratch_operands = 0 : i64, tpu.core_type = #tpu.core_type<tc>, window_params = [{transform_indices = @transform_0, window_bounds = array<i64: 8, 32>}, {pipeline_mode = #tpu.pipeline_mode<synchronous>, transform_indices = @transform_1, window_bounds = array<i64: 32, 16>}, {pipeline_mode = #tpu.pipeline_mode<synchronous>, transform_indices = @transform_2, window_bounds = array<i64: 1, 16>}, {pipeline_mode = #tpu.pipeline_mode<synchronous>, transform_indices = @transform_3, window_bounds = array<i64: 32, 16>}, {pipeline_mode = #tpu.pipeline_mode<synchronous>, transform_indices = @transform_4, window_bounds = array<i64: 1, 16>}, {transform_indices = @transform_5, window_bounds = array<i64: 8, 1>}, {transform_indices = @transform_6, window_bounds = array<i64: 8, 16>}, {transform_indices = @transform_7, window_bounds = array<i64: 8, 16>}, {transform_indices = @transform_8, window_bounds = array<i64: 8, 16>}, {transform_indices = @transform_9, window_bounds = array<i64: 8, 16>}]} {
    %c0 = arith.constant 0 : index
    %c0_0 = arith.constant 0 : index
    %0 = vector.load %arg1[%c0, %c0_0] : memref<8x32xf32, #tpu.memory_space<vmem>>, vector<8x32xf32>
    %c0_1 = arith.constant 0 : index
    %c0_2 = arith.constant 0 : index
    %1 = vector.load %arg2[%c0_1, %c0_2] : memref<32x16xf32, #tpu.memory_space<vmem>>, vector<32x16xf32>
    %cst = arith.constant dense<0.000000e+00> : vector<8x16xf32>
    %2 = tpu.matmul %0, %1, %cst {dimension_numbers = #tpu.dot_dimension_numbers<[1], [0], [0], [1], [0, 0, 1, 1], [], []>} : vector<8x32xf32>, vector<32x16xf32>, vector<8x16xf32> -> vector<8x16xf32>
    %c0_3 = arith.constant 0 : index
    %c0_4 = arith.constant 0 : index
    %3 = vector.load %arg3[%c0_3, %c0_4] : memref<1x16xf32, #tpu.memory_space<vmem>>, vector<1x16xf32>
    %4 = vector.broadcast %3 : vector<1x16xf32> to vector<8x16xf32>
    %5 = arith.addf %2, %4 : vector<8x16xf32>
    %c0_5 = arith.constant 0 : index
    %c0_6 = arith.constant 0 : index
    %6 = vector.load %arg4[%c0_5, %c0_6] : memref<32x16xf32, #tpu.memory_space<vmem>>, vector<32x16xf32>
    %cst_7 = arith.constant dense<0.000000e+00> : vector<8x16xf32>
    %7 = tpu.matmul %0, %6, %cst_7 {dimension_numbers = #tpu.dot_dimension_numbers<[1], [0], [0], [1], [0, 0, 1, 1], [], []>} : vector<8x32xf32>, vector<32x16xf32>, vector<8x16xf32> -> vector<8x16xf32>
    %c0_8 = arith.constant 0 : index
    %c0_9 = arith.constant 0 : index
    %8 = vector.load %arg5[%c0_8, %c0_9] : memref<1x16xf32, #tpu.memory_space<vmem>>, vector<1x16xf32>
    %9 = vector.broadcast %8 : vector<1x16xf32> to vector<8x16xf32>
    %10 = arith.addf %7, %9 : vector<8x16xf32>
    %c0_10 = arith.constant 0 : index
    %c0_11 = arith.constant 0 : index
    %11 = vector.load %arg8[%c0_10, %c0_11] : memref<8x16xf32, #tpu.memory_space<vmem>>, vector<8x16xf32>
    tpu.vector_store %arg8[%c0_10, %c0_11], %5 {strides = array<i32>} : memref<8x16xf32, #tpu.memory_space<vmem>>, vector<8x16xf32>,
    %c0_12 = arith.constant 0 : index
    %c0_13 = arith.constant 0 : index
    %12 = vector.load %arg9[%c0_12, %c0_13] : memref<8x16xf32, #tpu.memory_space<vmem>>, vector<8x16xf32>
    tpu.vector_store %arg9[%c0_12, %c0_13], %10 {strides = array<i32>} : memref<8x16xf32, #tpu.memory_space<vmem>>, vector<8x16xf32>,
    %cst_14 = arith.constant 5.000000e-01 : f32
    %13 = vector.broadcast %cst_14 : f32 to vector<8x16xf32>
    %14 = arith.mulf %13, %10 : vector<8x16xf32>
    %15 = math.exp %14 : vector<8x16xf32>
    %c0_15 = arith.constant 0 : index
    %c0_16 = arith.constant 0 : index
    %16 = vector.load %arg7[%c0_15, %c0_16] : memref<8x16xf32, #tpu.memory_space<vmem>>, vector<8x16xf32>
    %17 = arith.mulf %15, %16 : vector<8x16xf32>
    %18 = arith.addf %5, %17 : vector<8x16xf32>
    %c0_17 = arith.constant 0 : index
    %c0_18 = arith.constant 0 : index
    %19 = vector.load %arg6[%c0_17, %c0_18] : memref<8x1xf32, #tpu.memory_space<vmem>>, vector<8x1xf32>
    %20 = vector.broadcast %19 : vector<8x1xf32> to vector<8x16xf32>
    %21 = arith.mulf %18, %20 : vector<8x16xf32>
    %c0_19 = arith.constant 0 : index
    %c0_20 = arith.constant 0 : index
    %22 = vector.load %arg10[%c0_19, %c0_20] : memref<8x16xf32, #tpu.memory_space<vmem>>, vector<8x16xf32>
    tpu.vector_store %arg10[%c0_19, %c0_20], %21 {strides = array<i32>} : memref<8x16xf32, #tpu.memory_space<vmem>>, vector<8x16xf32>,
    return
  }
  func.func @transform_0(%arg0: i32) -> (i32, i32) {
    %c0_i32 = arith.constant 0 : i32
    %c0_i32_0 = arith.constant 0 : i32
    return %arg0, %c0_i32 : i32, i32
  }
  func.func @transform_1(%arg0: i32) -> (i32, i32) {
    %c0_i32 = arith.constant 0 : i32
    %c0_i32_0 = arith.constant 0 : i32
    %c0_i32_1 = arith.constant 0 : i32
    return %c0_i32, %c0_i32_0 : i32, i32
  }
  func.func @transform_2(%arg0: i32) -> (i32, i32) {
    %c0_i32 = arith.constant 0 : i32
    %c0_i32_0 = arith.constant 0 : i32
    %c0_i32_1 = arith.constant 0 : i32
    return %c0_i32, %c0_i32_0 : i32, i32
  }
  func.func @transform_3(%arg0: i32) -> (i32, i32) {
    %c0_i32 = arith.constant 0 : i32
    %c0_i32_0 = arith.constant 0 : i32
    %c0_i32_1 = arith.constant 0 : i32
    return %c0_i32, %c0_i32_0 : i32, i32
  }
  func.func @transform_4(%arg0: i32) -> (i32, i32) {
    %c0_i32 = arith.constant 0 : i32
    %c0_i32_0 = arith.constant 0 : i32
    %c0_i32_1 = arith.constant 0 : i32
    return %c0_i32, %c0_i32_0 : i32, i32
  }
  func.func @transform_5(%arg0: i32) -> (i32, i32) {
    %c0_i32 = arith.constant 0 : i32
    %c0_i32_0 = arith.constant 0 : i32
    return %arg0, %c0_i32 : i32, i32
  }
  func.func @transform_6(%arg0: i32) -> (i32, i32) {
    %c0_i32 = arith.constant 0 : i32
    %c0_i32_0 = arith.constant 0 : i32
    return %arg0, %c0_i32 : i32, i32
  }
  func.func @transform_7(%arg0: i32) -> (i32, i32) {
    %c0_i32 = arith.constant 0 : i32
    %c0_i32_0 = arith.constant 0 : i32
    return %arg0, %c0_i32 : i32, i32
  }
  func.func @transform_8(%arg0: i32) -> (i32, i32) {
    %c0_i32 = arith.constant 0 : i32
    %c0_i32_0 = arith.constant 0 : i32
    return %arg0, %c0_i32 : i32, i32
  }
  func.func @transform_9(%arg0: i32) -> (i32, i32) {
    %c0_i32 = arith.constant 0 : i32
    %c0_i32_0 = arith.constant 0 : i32
    return %arg0, %c0_i32 : i32, i32
  }
}

</mosaic_0001>

<bundles_post_ra>
// kernel: gaussian_layer_forward.1
= control target key start
LH: loop header
LB: loop body
LE: loop exit
PB: predicated region body
PF: predicated region fallthrough
CT: control target
= control target key end

     0   :  { %s1286_s0 = inlined_call_operand.vmem [shape: f32[16,32], index: 0, kind: input, shape index: {}]   ;;  %s1287_s1 = inlined_call_operand.vmem [shape: f32[32,16], index: 1, kind: input, shape index: {}]   ;;  %s1288_s2 = inlined_call_operand.vmem [shape: f32[1,16], index: 2, kind: input, shape index: {}]   ;;  %s1289_s3 = inlined_call_operand.vmem [shape: f32[32,16], index: 3, kind: input, shape index: {}]   ;;  %s1290_s4 = inlined_call_operand.vmem [shape: f32[1,16], index: 4, kind: input, shape index: {}]   ;;  %s1291_s5 = inlined_call_operand.vmem [shape: f32[16,1], index: 5, kind: input, shape index: {}]   ;;  %s1292_s6 = inlined_call_operand.vmem [shape: f32[16,16], index: 6, kind: input, shape index: {}]   ;;  %s1293_s7 = inlined_call_operand.hbm [shape: f32[16,16], index: 7, kind: output, shape index: {0}]   ;;  %s1294_s8 = inlined_call_operand.hbm [shape: f32[16,16], index: 8, kind: output, shape index: {1}]   ;;  %s1295_s9 = inlined_call_operand.hbm [shape: f32[16,16], index: 9, kind: output, shape index: {2}]  }
   0x1   :  { %1299 = sst [smem:[#allocation9_spill]] %s1286_s0 }
   0x2   :  { %1300 = sst [smem:[#allocation10_spill]] %s1287_s1 }
   0x3   :  { %1301 = sst [smem:[#allocation11_spill]] %s1288_s2 }
   0x4   :  { %15 = vsyncpa [#allocation3], 0 }
   0x5   :  { %17 = vsyncpa [#allocation3 + $0x1], 0 }
   0x6   :  { %18 = vsyncpa [#allocation5], 0 }
   0x7   :  { %20 = vsyncpa [#allocation5 + $0x1], 0  ;;  %s1061_s30 = smov 0   ;;  %s1063_s10 = smov 0  }
   0x8   :  { %s1065_s11 = smov 0   ;;  %s1067_s12 = smov 0  }
   0x9 LB: > { %s1082_s13 = sadd.s32 4294967295, %s1002_s12   ;;  %s1296_s14 = sadd.s32 4294967294, %s1002_s12   ;;  %s1002_s12 = sphi %s1067_s12, %s1313_s12   ;;  %s998_s11 = sphi %s1065_s11, %s1312_s11   ;;  %s994_s10 = sphi %s1063_s10, %s1311_s10   ;;  %s990_s30 = sphi %s1061_s30, %s1310_s30  }
   0xa   : > { %s1086_s15 = sadd.s32 1, %s1002_s12   ;;  %s195_s16 = sadd.s32 1, %s998_s11 }
   0xb   : > { %s192_s17 = ssub.s32 %s1002_s12, %s1086_s15  ;;  %p205_p0 = scmp.ne.s32.totalorder %s998_s11, %s994_s10 }
   0xc   : > { %p193_p1 = scmp.eq.s32.totalorder %s192_s17, 0  ;;  %p206_p2 = scmp.eq.s32.totalorder %s1082_s13, 1 }
   0xd   : > { %p211_p3 = scmp.ne.s32.totalorder %s994_s10, %s990_s30  ;;  %p212_p4 = scmp.eq.s32.totalorder %s1296_s14, 1 }
   0xe   : > { %s1099_s18 = scalar_select %p193_p1, %s998_s11, %s195_s16  }
   0xf   : > { %p1101_p5 = por %p206_p2, %p205_p0  ;;  %p1105_p6 = por %p212_p4, %p211_p3 }
  0x10   : > { %p761_p7 = scmp.ge.s32.totalorder %s1002_s12, 1  ;;  %p315_p8 = scmp.lt.s32.totalorder %s1002_s12, 3 }
  0x12   : > { %p316_p9 = pnand %p761_p7, %p315_p8 }
  0x13   : > { %v466_v0 = vld [vmem:[%s1289_s3] sm:$0xff] (!%p316_p9)  ;;  %v467_v1 = vld [vmem:[%s1289_s3 + $0x8] sm:$0xff] (!%p316_p9)  ;;  %v468_v2 = vld [vmem:[%s1289_s3 + $0x10] sm:$0xff] (!%p316_p9)  ;;  %v1004_v3 = vmov (!%p316_p9), 0.0|0.0   ;;  %vm1005_vm0 = vmmov (!%p316_p9), 0   ;;  %v1006_v6 = vmov (!%p316_p9), 0.0  }
  0x14   : > { %319 = sbr.rel (%p316_p9) target bundleno = 317 (0x13d), region = 48  ;;  %818 = vmatprep.subr.bf16.mxu1 (!%p316_p9), %v1004_v3  ;;  %v819_v4 = vpack.c.bf16 (!%p316_p9), %v467_v1, %v466_v0  ;;  %v469_v5 = vld [vmem:[%s1289_s3 + $0x18] sm:$0xff] (!%p316_p9)  ;;  %809 = vmatprep.mubr.msk.f32.mxu1 (!%p316_p9), %vm1005_vm0, %v1006_v6  ;;  %p368_p10 = scmp.lt.s32.totalorder (!%p316_p9), %s1082_s13, 1  ;;  %v1007_v13 = vmov (!%p316_p9), 0   ;;  %vm392_vm1 = vcmask (!%p316_p9), 261120   ;;  %vm547_vm2 = vcmask (!%p316_p9), 130048  }
  0x15   : > { %s1304_s1 = sld [smem:[#allocation10_spill]] (!%p316_p9)  ;;  %812 = vmatprep.subr.bf16.mxu0 (!%p316_p9), %v1004_v3  ;;  %798 = vmatprep.mubr.msk.f32.mxu0 (!%p316_p9), %vm1005_vm0, %v1006_v6  ;;  %v822_v12 = vpack.c.bf16 (!%p316_p9), %v469_v5, %v468_v2  ;;  %s1305_s0 = sld [smem:[#allocation9_spill]] (!%p316_p9)  ;;  %v770_v17 = vld [vmem:[%s1290_s4] ss:$0 sm:$0xff] (!%p316_p9) }
  0x16   : > { %820 = vmatpush3.bf16.msra.mxu1 (!%p316_p9), %v819_v4  ;;  %877 = vset.pattern.permute.xlu0 (!%p316_p9), %v1007_v13  ;;  %s1297_s23 = sand.u32 (!%p316_p9), 1, %s994_s10   ;;  %s569_s25 = sand.u32 (!%p316_p9), 1, %s1082_s13  }
  0x17   : > { %821 = vmatprep.subr.bf16.mxu1 (!%p316_p9), %v1004_v3  ;;  %s1150_s24 = sshll.u32 (!%p316_p9), %s1297_s23, 3  ;;  %s1306_s2 = sld [smem:[#allocation11_spill]] (!%p316_p9) }
  0x18   : > { %s1298_s14 = scalar_lea.vmem (!%p316_p9), [#allocation2], %s1150_s24 }
  0x19   : > { %s588_s23 = sshll.u32 (!%p316_p9), %s1298_s14, 4  ;;  %s1182_s23 = int_to_ptr.vmem [resolvable:$true] %s588_s23 }
  0x1a   : > { %823 = vmatpush3.bf16.msra.mxu1 (!%p316_p9), %v822_v12 }
  0x1b   : > { %v381_v7 = vld [vmem:[%s1304_s1] sm:$0xff]  ;;  %v382_v8 = vld [vmem:[%s1304_s1 + $0x8] sm:$0xff]  ;;  %v383_v10 = vld [vmem:[%s1304_s1 + $0x10] sm:$0xff]  ;;  %s369_s26 = scalar_select %p368_p10, %s1082_s13, 1 }
  0x1c   : > { %v813_v9 = vpack.c.bf16 %v382_v8, %v381_v7  ;;  %v384_v11 = vld [vmem:[%s1304_s1 + $0x18] sm:$0xff] }
  0x1d   : > { %v816_v14 = vpack.c.bf16 %v384_v11, %v383_v10  ;;  %s1137_s27 = sshll.u32 %s369_s26, 3  ;;  %s1154_s26 = sshll.u32 %s1082_s13, 7  ;;  %v768_v18 = vld [vmem:[%s1306_s2] ss:$0 sm:$0xff] }
  0x1e   : > { %814 = vmatpush3.bf16.msra.mxu0 %v813_v9  ;;  %s371_s16 = scalar_lea.vmem %s1305_s0, %s1137_s27  ;;  %s375_s22 = scalar_lea.vmem %s1291_s5, %s1137_s27 }
  0x1f   : > { %815 = vmatprep.subr.bf16.mxu0 %v1004_v3  ;;  %v380_v15 = vld [vmem:[%s371_s16] sm:$0xff]  ;;  %s360_s16 = scalar_lea.vmem [#allocation4], %s1150_s24  ;;  %s1170_s1 = scalar_lea.hbm %s1294_s8, %s1154_s26 }
  0x20   : > { %v556_v16 = vld [vmem:[%s375_s22] sm:$0xff]  ;;  %810 = vmatmul.mubr.msk.f32.vlgmr.msra.gmra.mrb[0].mxu1 %vm392_vm1, %v380_v15  ;;  %s601_s17 = sshll.u32 %s360_s16, 4  ;;  %s1180_s21 = scalar_lea.hbm %s1293_s7, %s1154_s26  ;;  %s1172_s17 = int_to_ptr.vmem [resolvable:$true] %s601_s17 }
  0x21   : > { %559 = vperm.xlu0 %877, %v556_v16   ;;  %s1185_s0 = scalar_lea.sflag [#allocation5], %s569_s25  ;;  %s880_s22 = scalar_lea.vmem %s1172_s17, 128 }
  0x22   : > { %817 = vmatpush3.bf16.msra.mxu0 %v816_v14  ;;  %p881_p11 = scmp.ne.s32.totalorder %s1172_s17, %s880_s22  ;;  %s1008_s13 = smov [#allocation4]  }
  0x23   : > { %s884_s14 = sshll.u32 %s1008_s13, 4  ;;  %s885_s14 = int_to_ptr.vmem [resolvable:$false] %s884_s14 }
  0x24   : > { %p882_p12 = pnand %p881_p11, %p1101_p5  ;;  %s886_s2 = scalar_lea.vmem %s885_s14, 256 }
  0x25   : > { %799 = vmatmul.mubr.msk.f32.vlgmr.msra.gmra.mrb[0].mxu0 %vm392_vm1, %v380_v15  ;;  %p887_p0 = scmp.lt.s32.totalorder %s1172_s17, %s885_s14  ;;  %p888_p1 = scmp.lt.s32.totalorder %s886_s2, %s880_s22 }
  0x26   : > { %p883_p13 = pneg %p882_p12 }
  0x27   : > { %p889_p2 = por %p888_p1, %p887_p0 }
  0x29   : > { %p890_p3 = pnand %p889_p2, %p883_p13 }
  0xf3   : > { %v543_v19 = vpop.f32.mrb[0].mxu1 }
  0xf4   : > { %v544_v20 = vadd.f32 %v770_v17, %v543_v19  ;;  %v811_v21 = vpop.f32.mrb[1].mxu1 }
  0xf6   : > { %v550_v25 = vmul.f32 0.5, %v544_v20  ;;  %549 = vst.msk [vmem:[%s360_s16] sm:$0xff] %vm547_vm2, %v544_v20 }
  0xf8   : > { %v462_v22 = vpop.f32.mrb[0].mxu0 }
  0xf9   : > { %v1174_v23 = vadd.f32 %v768_v18, %v462_v22  ;;  %v800_v24 = vpop.f32.mrb[1].mxu0 }
  0xfa   : > { %893 = shalt.err (!%p890_p3)
}
  0xfb   : > { %s894_s25 = scalar_lea.hbm %s1170_s1, 128  ;;  %s898_s29 = scalar_lea.hbm %s1294_s8, 256 }
  0xfc   : > { %p895_p4 = scmp.ne.s32.totalorder %s1170_s1, %s894_s25  ;;  %p899_p9 = scmp.lt.u32.totalorder %s1170_s1, %s1294_s8 }
  0xfd   : > { %p900_p10 = scmp.lt.u32.totalorder %s898_s29, %s894_s25  ;;  %p902_p12 = scmp.lt.u32.totalorder %s894_s25, %s1170_s1 }
  0xfe   : > { %p896_p7 = pnand %p895_p4, %p1101_p5 }
  0xff   : > { %p901_p11 = por %p900_p10, %p899_p9 }
 0x100   : > { %p897_p8 = pneg %p896_p7 }
 0x101   : > { %p903_p13 = por %p902_p12, %p901_p11 }
 0x103   : > { %p904_p0 = pnand %p903_p13, %p897_p8 }
 0x105   : > { %907 = shalt.err (!%p904_p0)
}
 0x106   : > { %825 = dma.vmem_to_hbm [thread:$0]  (%p1101_p5), %s1172_s17, 128, %s1170_s1, %s1185_s0   ;;  %v551_v26 = vmul.f32 1.442695, %v550_v25 }
 0x107   : > { %s1307_s2 = scalar_lea.vmem [#allocation2], %s1150_s24  ;;  %s1308_s22 = sand.u32 1, %s994_s10  }
 0x108   : > { %548 = vst.msk [vmem:[%s1307_s2] sm:$0xff] %vm547_vm2, %v1174_v23  ;;  %s565_s25 = scalar_lea.sflag [#allocation3], %s1308_s22  ;;  %s908_s16 = scalar_lea.vmem %s1182_s23, 128 }
 0x109   : > { %p909_p1 = scmp.ne.s32.totalorder %s1182_s23, %s908_s16  ;;  %s1009_s28 = smov [#allocation2]  }
 0x10a   : > { %s912_s29 = sshll.u32 %s1009_s28, 4  ;;  %s913_s29 = int_to_ptr.vmem [resolvable:$false] %s912_s29 }
 0x10b   : > { %p910_p2 = pnand %p909_p1, %p1101_p5  ;;  %s914_s13 = scalar_lea.vmem %s913_s29, 256 }
 0x10c   : > { %p915_p4 = scmp.lt.s32.totalorder %s1182_s23, %s913_s29  ;;  %p916_p7 = scmp.lt.s32.totalorder %s914_s13, %s908_s16 }
 0x10d   : > { %p911_p3 = pneg %p910_p2 }
 0x10e   : > { %p917_p8 = por %p916_p7, %p915_p4 }
 0x110   : > { %p918_p9 = pnand %p917_p8, %p911_p3 }
 0x112   : > { %921 = shalt.err (!%p918_p9)
}
 0x113   : > { %s922_s1 = scalar_lea.hbm %s1180_s21, 128  ;;  %s926_s2 = scalar_lea.hbm %s1293_s7, 256 }
 0x114   : > { %p923_p10 = scmp.ne.s32.totalorder %s1180_s21, %s922_s1  ;;  %p927_p13 = scmp.lt.u32.totalorder %s1180_s21, %s1293_s7 }
 0x115   : > { %p928_p0 = scmp.lt.u32.totalorder %s926_s2, %s922_s1  ;;  %p930_p2 = scmp.lt.u32.totalorder %s922_s1, %s1180_s21 }
 0x116   : > { %p924_p11 = pnand %p923_p10, %p1101_p5 }
 0x117   : > { %p929_p1 = por %p928_p0, %p927_p13 }
 0x118   : > { %p925_p12 = pneg %p924_p11 }
 0x119   : > { %p931_p3 = por %p930_p2, %p929_p1 }
 0x11b   : > { %p932_p4 = pnand %p931_p3, %p925_p12 }
 0x11d   : > { %935 = shalt.err (!%p932_p4)
}
 0x11e   : > { %824 = dma.vmem_to_hbm [thread:$0]  (%p1101_p5), %s1182_s23, 128, %s1180_s21, %s565_s25   ;;  %878 = vpow2.f32 %v551_v26  ;;  %v560_v30 = vpop.permute.xlu0 %559 }
 0x11f   : > { %s379_s13 = scalar_lea.vmem %s1292_s6, %s1137_s27  ;;  %s367_s1 = scalar_lea.vmem [#allocation6], %s1150_s24 }
 0x120   : > { %v553_v27 = vld [vmem:[%s379_s13] sm:$0xff]  ;;  %s614_s17 = sshll.u32 %s367_s1, 4  ;;  %s1246_s22 = scalar_lea.hbm %s1295_s9, %s1154_s26  ;;  %s615_s17 = int_to_ptr.vmem [resolvable:$true] %s614_s17 }
 0x121   : > { %s936_s23 = scalar_lea.vmem %s615_s17, 128  ;;  %s1010_s27 = smov [#allocation6]  }
 0x122   : > { %p937_p7 = scmp.ne.s32.totalorder %s615_s17, %s936_s23  ;;  %s940_s21 = sshll.u32 %s1010_s27, 4  ;;  %s941_s21 = int_to_ptr.vmem [resolvable:$false] %s940_s21 }
 0x123   : > { %s942_s24 = scalar_lea.vmem %s941_s21, 256  ;;  %p943_p10 = scmp.lt.s32.totalorder %s615_s17, %s941_s21 }
 0x124   : > { %p938_p8 = pnand %p937_p7, %p1101_p5  ;;  %p944_p11 = scmp.lt.s32.totalorder %s942_s24, %s936_s23 }
 0x126   : > { %p939_p9 = pneg %p938_p8  ;;  %p945_p12 = por %p944_p11, %p943_p10 }
 0x128   : > { %v879_v28 = vpop.eup %878  ;;  %p946_p13 = pnand %p945_p12, %p939_p9 }
 0x129   : > { %v554_v29 = vmul.f32 %v879_v28, %v553_v27 }
 0x12b   : > { %v555_v31 = vadd.f32 %v554_v29, %v1174_v23 }
 0x12d   : > { %v562_v32 = vmul.f32 %v560_v30, %v555_v31 }
 0x12f   : > { %563 = vst.msk [vmem:[%s367_s1] sm:$0xff] %vm547_vm2, %v562_v32 }
 0x130   : > { %949 = shalt.err (!%p946_p13)
}
 0x131   : > { %s950_s26 = scalar_lea.hbm %s1246_s22, 128  ;;  %s954_s16 = scalar_lea.hbm %s1295_s9, 256 }
 0x132   : > { %p951_p0 = scmp.ne.s32.totalorder %s1246_s22, %s950_s26  ;;  %p955_p3 = scmp.lt.u32.totalorder %s1246_s22, %s1295_s9 }
 0x133   : > { %p956_p4 = scmp.lt.u32.totalorder %s954_s16, %s950_s26  ;;  %p958_p8 = scmp.lt.u32.totalorder %s950_s26, %s1246_s22 }
 0x134   : > { %p952_p1 = pnand %p951_p0, %p1101_p5 }
 0x135   : > { %p957_p7 = por %p956_p4, %p955_p3 }
 0x136   : > { %p953_p2 = pneg %p952_p1 }
 0x137   : > { %p959_p9 = por %p958_p8, %p957_p7 }
 0x139   : > { %p960_p10 = pnand %p959_p9, %p953_p2 }
 0x13b   : > { %963 = shalt.err (!%p960_p10)
}
 0x13c   : > { %826 = dma.vmem_to_hbm [thread:$0]  (%p1101_p5), %s615_s17, 128, %s1246_s22, %s1185_s0  }
 0x13d PF: > { %p840_p11 = scmp.ge.s32.totalorder %s1002_s12, 2  ;;  %s626_s1 = sand.u32 1, %s990_s30  }
 0x13e   : > { %s627_s14 = scalar_lea.sflag [#allocation3], %s626_s1 }
 0x13f   : > { %p831_p12 = pnand %p840_p11, %p1105_p6 }
 0x141   : > { %981 = dma.done.wait (!%p831_p12), %s627_s14, 128  }
 0x142   : > { %983 = vsyncadd (!%p831_p12), %s627_s14, 4294967168  ;;  %s1309_s2 = sadd.s32 4294967294, %s1002_s12  }
 0x143   : > { %s635_s23 = sand.u32 1, %s1309_s2  }
 0x144   : > { %s636_s27 = scalar_lea.sflag [#allocation5], %s635_s23 }
 0x145   : > { %985 = dma.done.wait (!%p831_p12), %s636_s27, 256  }
 0x146   : > { %987 = vsyncadd (!%p831_p12), %s636_s27, 4294967040  ;;  %p23_p5 = scmp.ge.s32.totalorder %s1086_s15, 4   ;;  %s1310_s30 = smov %s994_s10 }
 0x147   : > { %s1311_s10 = smov %s998_s11  ;;  %s1312_s11 = smov %s1099_s18 }
 0x148   : > { %s1313_s12 = smov %s1086_s15  ;;  %25 = sbr.rel (!%p23_p5) target bundleno = 9 (0x9), region = 121 }
 0x14f   :  { %650 = vsyncpa [#allocation3], 1 }
 0x150   :  { %652 = vsyncpa [#allocation3 + $0x1], 1 }
 0x151   :  { %653 = vsyncpa [#allocation5], 1 }
 0x152   :  { %655 = vsyncpa [#allocation5 + $0x1], 1 }

</bundles_post_ra>
